<compile_context>
chip_gen: v7x
topology: tpu7x:2x2x1
jax: 0.10.0
libtpu: 0.0.40
codegen_flags: <defaults>
</compile_context>

<pallas_src>
import functools

import jax
import jax.numpy as jnp
from jax.experimental import pallas as pl
from jax.experimental.pallas import tpu as pltpu


# ----------------------------- Pallas kernel -------------------------------

def heads_kernel(
    lhs_ref,        # (1, L, D)   last_hidden_state (one batch element)
    hdr_ref,        # (1, H, D)   headers_encode    (gathered CLS positions)
    hmask_ref,      # (1, H, 1)   cls_headers_mask (float32)
    w_lq_ref,       # (D, F+O)    [w_q | w_ops]
    b_lq_ref,       # (1, F+O)
    w_ha_ref,       # (D, F+A)    [w_h | w_agg]
    b_ha_ref,       # (1, F+A)
    w_sim_ref,      # (1, F)      similar_fnn weight as a row vector
    b_sim_ref,      # (1, 1)
    agg_out_ref,    # (1, H, A)
    colsT_out_ref,  # (1, H, L)   transposed cond_cols (lane-dense: L on lanes)
    ops_out_ref,    # (1, L, O)
    *, feat, h_tile,
):
    F = feat
    HT = h_tile
    H = hdr_ref.shape[1]
    O = ops_out_ref.shape[2]
    A = agg_out_ref.shape[2]

    # ---- fused question/cond_ops matmul over the full sequence (one pass) ----
    x = lhs_ref[0]                                                   # (L, D)
    qo = (jnp.dot(x, w_lq_ref[...], preferred_element_type=jnp.float32)
          + b_lq_ref[...])                                           # (L, F+O)
    q = qo[:, :F]                                                    # (L, F)
    ops_out_ref[0] = qo[:, F:F + O]                                  # (L, O)

    wsim = w_sim_ref[...]                                            # (1, F)
    bsim = b_sim_ref[...]                                            # (1, 1)

    # ---- header tiles: fused headers/agg matmul + pairwise tanh reduce ----
    n_tiles = H // HT
    for i in range(n_tiles):                 # static offsets -> static slices
        hs = i * HT
        hdr_t = hdr_ref[0, hs:hs + HT, :]                            # (HT, D)
        ha = (jnp.dot(hdr_t, w_ha_ref[...],
                      preferred_element_type=jnp.float32)
              + b_ha_ref[...])                                       # (HT, F+A)
        h_enc = ha[:, :F]                                            # (HT, F)
        agg_out_ref[0, hs:hs + HT, :] = ha[:, F:F + A]               # (HT, A)

        # pairwise tanh, bounded to (HT, L, F) live VMEM per tile
        t = jnp.tanh(h_enc[:, None, :] + q[None, :, :])              # (HT, L, F)
        # VPU multiply + lane reduction instead of an N=1 MXU matmul
        sim = jnp.sum(t * wsim, axis=-1) + bsim                      # (HT, L)

        penalty = (1.0 - hmask_ref[0, hs:hs + HT, :]) * 1e10         # (HT, 1)
        colsT_out_ref[0, hs:hs + HT, :] = sim - penalty              # (HT, L)


def run_heads(last_hidden_state, headers_encode, cls_headers_mask, p):
    B, L, D = last_hidden_state.shape
    H = headers_encode.shape[1]
    F = p["w_q"].shape[1]
    A = p["w_agg"].shape[1]
    O = p["w_ops"].shape[1]

    # ---- fused head weights (done once per call in the wrapper) ----
    w_lq = jnp.concatenate([p["w_q"], p["w_ops"]], axis=1)           # (D, F+O)
    b_lq = jnp.concatenate([p["b_q"], p["b_ops"]], axis=1)           # (1, F+O)
    w_ha = jnp.concatenate([p["w_h"], p["w_agg"]], axis=1)           # (D, F+A)
    b_ha = jnp.concatenate([p["b_h"], p["b_agg"]], axis=1)           # (1, F+A)
    w_sim_row = p["w_sim"].T                                          # (1, F)
    b_sim = p["b_sim"]                                                # (1, 1)

    hmask = cls_headers_mask.astype(jnp.float32)[..., None]           # (B, H, 1)

    # header tile size: 8 rows (sublane granularity) bounds the tanh buffer
    h_tile = 8 if (H % 8 == 0) else H

    kernel = functools.partial(heads_kernel, feat=F, h_tile=h_tile)

    full = lambda arr: pl.BlockSpec(arr.shape, lambda b, _n=arr.ndim: (0,) * _n)

    grid_spec = pltpu.PrefetchScalarGridSpec(
        num_scalar_prefetch=0,
        grid=(B,),
        in_specs=[
            pl.BlockSpec((1, L, D), lambda b: (b, 0, 0)),   # last_hidden_state
            pl.BlockSpec((1, H, D), lambda b: (b, 0, 0)),   # headers_encode
            pl.BlockSpec((1, H, 1), lambda b: (b, 0, 0)),   # cls_headers_mask
            full(w_lq), full(b_lq),
            full(w_ha), full(b_ha),
            full(w_sim_row), full(b_sim),
        ],
        out_specs=[
            pl.BlockSpec((1, H, A), lambda b: (b, 0, 0)),   # y_hat_agg
            pl.BlockSpec((1, H, L), lambda b: (b, 0, 0)),   # cond_cols (transposed)
            pl.BlockSpec((1, L, O), lambda b: (b, 0, 0)),   # y_hat_cond_ops
        ],
    )

    out_shape = (
        jax.ShapeDtypeStruct((B, H, A), jnp.float32),
        jax.ShapeDtypeStruct((B, H, L), jnp.float32),
        jax.ShapeDtypeStruct((B, L, O), jnp.float32),
    )

    agg, colsT, ops = pl.pallas_call(
        kernel,
        out_shape=out_shape,
        grid_spec=grid_spec,
        compiler_params=pltpu.CompilerParams(
            dimension_semantics=("parallel",),
            vmem_limit_bytes=32 * 1024 * 1024,
        ),
    )(last_hidden_state, headers_encode, hmask,
      w_lq, b_lq, w_ha, b_ha, w_sim_row, b_sim)

    cols = jnp.transpose(colsT, (0, 2, 1))   # back to the (B, L, H) contract
    return agg, cols, ops


# ------------------------------- wrapper ------------------------------------

def init_params(key, hidden_size, agg_out, cond_conn_op_out, cond_ops_out, vocab):
    ks = jax.random.split(key, 16)
    s = 0.02
    F = 256
    return {
        # stand-in "BERT" params (plain-JAX glue)
        "embed": jax.random.normal(ks[0], (vocab, hidden_size), jnp.float32) * s,
        "w_pool": jax.random.normal(ks[1], (hidden_size, hidden_size), jnp.float32) * s,
        "b_pool": jnp.zeros((hidden_size,), jnp.float32),
        # head params (biases shaped (1, N) for TPU 2D layout)
        "w_agg": jax.random.normal(ks[2], (hidden_size, agg_out), jnp.float32) * s,
        "b_agg": jax.random.normal(ks[3], (1, agg_out), jnp.float32) * s,
        "w_conn": jax.random.normal(ks[4], (hidden_size, cond_conn_op_out), jnp.float32) * s,
        "b_conn": jax.random.normal(ks[5], (1, cond_conn_op_out), jnp.float32) * s,
        "w_ops": jax.random.normal(ks[6], (hidden_size, cond_ops_out), jnp.float32) * s,
        "b_ops": jax.random.normal(ks[7], (1, cond_ops_out), jnp.float32) * s,
        "w_q": jax.random.normal(ks[8], (hidden_size, F), jnp.float32) * s,
        "b_q": jax.random.normal(ks[9], (1, F), jnp.float32) * s,
        "w_h": jax.random.normal(ks[10], (hidden_size, F), jnp.float32) * s,
        "b_h": jax.random.normal(ks[11], (1, F), jnp.float32) * s,
        "w_sim": jax.random.normal(ks[12], (F, 1), jnp.float32) * s,
        "b_sim": jax.random.normal(ks[13], (1, 1), jnp.float32) * s,
    }


@jax.jit
def model_forward(x, attention_mask, cls_headers, cls_headers_mask, params):
    """Mirrors Model.forward.  x:(B,L) int32 ids, attention_mask:(B,L),
    cls_headers:(B,H) int32 indices into the sequence, cls_headers_mask:(B,H)."""
    # ---- plain-JAX glue: stand-in for the pretrained BERT encoder ----
    # TODO(synk): real pretrained BERT not translatable; deterministic stub used.
    lhs = params["embed"][x] * attention_mask[..., None].astype(jnp.float32)   # (B,L,D)
    pooler = jnp.tanh(lhs[:, 0, :] @ params["w_pool"] + params["b_pool"])      # (B,D)

    # ---- torch.gather(last_hidden_state, 1, cls_headers[..., None].expand(..,D)) ----
    headers_encode = jnp.take_along_axis(lhs, cls_headers[:, :, None], axis=1)  # (B,H,D)

    # ---- cond_conn_op head: tiny (B,D)@(D,C) — kept on the XLA/VPU path ----
    y_conn = pooler @ params["w_conn"] + params["b_conn"]                       # (B,C)

    # ---- Pallas kernel for the large heads ----
    y_agg, y_cols, y_ops = run_heads(
        lhs, headers_encode, cls_headers_mask.astype(jnp.float32), params)
    return y_agg, y_conn, y_cols, y_ops


# ----------------------------- reference check ------------------------------

def reference_forward(x, attention_mask, cls_headers, cls_headers_mask, p):
    lhs = p["embed"][x] * attention_mask[..., None].astype(jnp.float32)
    pooler = jnp.tanh(lhs[:, 0, :] @ p["w_pool"] + p["b_pool"])
    hdr = jnp.take_along_axis(lhs, cls_headers[:, :, None], axis=1)
    y_conn = pooler @ p["w_conn"] + p["b_conn"]
    y_agg = hdr @ p["w_agg"] + p["b_agg"]
    y_ops = lhs @ p["w_ops"] + p["b_ops"]
    q = lhs[:, :, None, :] @ p["w_q"] + p["b_q"]      # (B,L,1,256)
    h = hdr[:, None, :, :] @ p["w_h"] + p["b_h"]      # (B,1,H,256)
    t = jnp.tanh(q + h)                               # (B,L,H,256)
    cols = (t @ p["w_sim"] + p["b_sim"])[..., 0]      # (B,L,H)
    cols = cols - (1.0 - cls_headers_mask.astype(jnp.float32))[:, None, :] * 1e10
    return y_agg, y_conn, cols, y_ops


if __name__ == "__main__":
    B, L, H, D = 2, 16, 8, 32
    agg_out, conn_out, cols_out, ops_out = 7, 3, 2, 5   # cols_out unused (as in module)
    vocab = 100

    key = jax.random.PRNGKey(0)
    kp, kx, km, kh, khm = jax.random.split(key, 5)

    params = init_params(kp, D, agg_out, conn_out, ops_out, vocab)

    x = jax.random.randint(kx, (B, L), 0, vocab, dtype=jnp.int32)
    attention_mask = jnp.ones((B, L), dtype=jnp.int32)
    cls_headers = jax.random.randint(kh, (B, H), 0, L, dtype=jnp.int32)
    cls_headers_mask = (jax.random.uniform(khm, (B, H)) > 0.3).astype(jnp.float32)

    outs = model_forward(x, attention_mask, cls_headers, cls_headers_mask, params)
    outs = jax.block_until_ready(outs)

    refs = reference_forward(x, attention_mask, cls_headers, cls_headers_mask, params)
    for o, r in zip(outs, refs):
        assert o.shape == r.shape, (o.shape, r.shape)
        assert jnp.allclose(o, r, atol=1e-3, rtol=1e-3), float(jnp.max(jnp.abs(o - r)))

    print("KERNEL_OK")
</pallas_src>

<mosaic_0001>
module attributes {stable_mosaic.version = 11 : i64} {
  func.func @heads_kernel(%arg0: i32, %arg1: memref<1x16x32xf32, #tpu.memory_space<vmem>>, %arg2: memref<1x8x32xf32, #tpu.memory_space<vmem>>, %arg3: memref<1x8x1xf32, #tpu.memory_space<vmem>>, %arg4: memref<32x261xf32, #tpu.memory_space<vmem>>, %arg5: memref<1x261xf32, #tpu.memory_space<vmem>>, %arg6: memref<32x263xf32, #tpu.memory_space<vmem>>, %arg7: memref<1x263xf32, #tpu.memory_space<vmem>>, %arg8: memref<1x256xf32, #tpu.memory_space<vmem>>, %arg9: memref<1x1xf32, #tpu.memory_space<vmem>>, %arg10: memref<1x8x7xf32, #tpu.memory_space<vmem>>, %arg11: memref<1x8x16xf32, #tpu.memory_space<vmem>>, %arg12: memref<1x16x5xf32, #tpu.memory_space<vmem>>) attributes {dimension_semantics = [#tpu.dimension_semantics<parallel>], iteration_bounds = array<i64: 2>, scalar_prefetch = 0 : i64, scratch_operands = 0 : i64, tpu.core_type = #tpu.core_type<tc>, window_params = [{transform_indices = @transform_0, window_bounds = array<i64: 1, 16, 32>}, {transform_indices = @transform_1, window_bounds = array<i64: 1, 8, 32>}, {transform_indices = @transform_2, window_bounds = array<i64: 1, 8, 1>}, {pipeline_mode = #tpu.pipeline_mode<synchronous>, transform_indices = @transform_3, window_bounds = array<i64: 32, 261>}, {pipeline_mode = #tpu.pipeline_mode<synchronous>, transform_indices = @transform_4, window_bounds = array<i64: 1, 261>}, {pipeline_mode = #tpu.pipeline_mode<synchronous>, transform_indices = @transform_5, window_bounds = array<i64: 32, 263>}, {pipeline_mode = #tpu.pipeline_mode<synchronous>, transform_indices = @transform_6, window_bounds = array<i64: 1, 263>}, {pipeline_mode = #tpu.pipeline_mode<synchronous>, transform_indices = @transform_7, window_bounds = array<i64: 1, 256>}, {pipeline_mode = #tpu.pipeline_mode<synchronous>, transform_indices = @transform_8, window_bounds = array<i64: 1, 1>}, {transform_indices = @transform_9, window_bounds = array<i64: 1, 8, 7>}, {transform_indices = @transform_10, window_bounds = array<i64: 1, 8, 16>}, {transform_indices = @transform_11, window_bounds = array<i64: 1, 16, 5>}]} {
    %c0 = arith.constant 0 : index
    %c0_0 = arith.constant 0 : index
    %c0_1 = arith.constant 0 : index
    %0 = vector.load %arg1[%c0, %c0_0, %c0_1] : memref<1x16x32xf32, #tpu.memory_space<vmem>>, vector<1x16x32xf32>
    %1 = vector.shape_cast %0 : vector<1x16x32xf32> to vector<16x32xf32>
    %c0_2 = arith.constant 0 : index
    %c0_3 = arith.constant 0 : index
    %2 = vector.load %arg4[%c0_2, %c0_3] : memref<32x261xf32, #tpu.memory_space<vmem>>, vector<32x261xf32>
    %cst = arith.constant dense<0.000000e+00> : vector<16x261xf32>
    %3 = tpu.matmul %1, %2, %cst {dimension_numbers = #tpu.dot_dimension_numbers<[1], [0], [0], [1], [0, 0, 1, 1], [], []>} : vector<16x32xf32>, vector<32x261xf32>, vector<16x261xf32> -> vector<16x261xf32>
    %c0_4 = arith.constant 0 : index
    %c0_5 = arith.constant 0 : index
    %4 = vector.load %arg5[%c0_4, %c0_5] : memref<1x261xf32, #tpu.memory_space<vmem>>, vector<1x261xf32>
    %5 = vector.broadcast %4 : vector<1x261xf32> to vector<16x261xf32>
    %6 = arith.addf %3, %5 : vector<16x261xf32>
    %7 = vector.extract_strided_slice %6 {offsets = [0, 0], sizes = [16, 256], strides = [1, 1]} : vector<16x261xf32> to vector<16x256xf32>
    %8 = vector.extract_strided_slice %6 {offsets = [0, 256], sizes = [16, 5], strides = [1, 1]} : vector<16x261xf32> to vector<16x5xf32>
    %c0_6 = arith.constant 0 : index
    %c0_7 = arith.constant 0 : index
    %c0_8 = arith.constant 0 : index
    %9 = vector.load %arg12[%c0_6, %c0_7, %c0_8] : memref<1x16x5xf32, #tpu.memory_space<vmem>>, vector<1x16x5xf32>
    %10 = vector.shape_cast %9 : vector<1x16x5xf32> to vector<16x5xf32>
    %11 = vector.shape_cast %8 : vector<16x5xf32> to vector<1x16x5xf32>
    tpu.vector_store %arg12[%c0_6, %c0_7, %c0_8], %11 {strides = array<i32>} : memref<1x16x5xf32, #tpu.memory_space<vmem>>, vector<1x16x5xf32>,
    %c0_9 = arith.constant 0 : index
    %c0_10 = arith.constant 0 : index
    %12 = vector.load %arg8[%c0_9, %c0_10] : memref<1x256xf32, #tpu.memory_space<vmem>>, vector<1x256xf32>
    %c0_11 = arith.constant 0 : index
    %c0_12 = arith.constant 0 : index
    %13 = vector.load %arg9[%c0_11, %c0_12] : memref<1x1xf32, #tpu.memory_space<vmem>>, vector<1x1xf32>
    %c0_13 = arith.constant 0 : index
    %c0_14 = arith.constant 0 : index
    %c0_15 = arith.constant 0 : index
    %14 = vector.load %arg2[%c0_13, %c0_14, %c0_15] : memref<1x8x32xf32, #tpu.memory_space<vmem>>, vector<1x8x32xf32>
    %15 = vector.shape_cast %14 : vector<1x8x32xf32> to vector<8x32xf32>
    %c0_16 = arith.constant 0 : index
    %c0_17 = arith.constant 0 : index
    %16 = vector.load %arg6[%c0_16, %c0_17] : memref<32x263xf32, #tpu.memory_space<vmem>>, vector<32x263xf32>
    %cst_18 = arith.constant dense<0.000000e+00> : vector<8x263xf32>
    %17 = tpu.matmul %15, %16, %cst_18 {dimension_numbers = #tpu.dot_dimension_numbers<[1], [0], [0], [1], [0, 0, 1, 1], [], []>} : vector<8x32xf32>, vector<32x263xf32>, vector<8x263xf32> -> vector<8x263xf32>
    %c0_19 = arith.constant 0 : index
    %c0_20 = arith.constant 0 : index
    %18 = vector.load %arg7[%c0_19, %c0_20] : memref<1x263xf32, #tpu.memory_space<vmem>>, vector<1x263xf32>
    %19 = vector.broadcast %18 : vector<1x263xf32> to vector<8x263xf32>
    %20 = arith.addf %17, %19 : vector<8x263xf32>
    %21 = vector.extract_strided_slice %20 {offsets = [0, 0], sizes = [8, 256], strides = [1, 1]} : vector<8x263xf32> to vector<8x256xf32>
    %22 = vector.extract_strided_slice %20 {offsets = [0, 256], sizes = [8, 7], strides = [1, 1]} : vector<8x263xf32> to vector<8x7xf32>
    %c0_21 = arith.constant 0 : index
    %c0_22 = arith.constant 0 : index
    %c0_23 = arith.constant 0 : index
    %23 = vector.load %arg10[%c0_21, %c0_22, %c0_23] : memref<1x8x7xf32, #tpu.memory_space<vmem>>, vector<1x8x7xf32>
    %24 = vector.shape_cast %23 : vector<1x8x7xf32> to vector<8x7xf32>
    %25 = vector.shape_cast %22 : vector<8x7xf32> to vector<1x8x7xf32>
    tpu.vector_store %arg10[%c0_21, %c0_22, %c0_23], %25 {strides = array<i32>} : memref<1x8x7xf32, #tpu.memory_space<vmem>>, vector<1x8x7xf32>,
    %26 = vector.shape_cast %21 : vector<8x256xf32> to vector<8x1x256xf32>
    %27 = vector.shape_cast %7 : vector<16x256xf32> to vector<1x16x256xf32>
    %28 = vector.broadcast %26 : vector<8x1x256xf32> to vector<8x16x256xf32>
    %29 = vector.broadcast %27 : vector<1x16x256xf32> to vector<8x16x256xf32>
    %30 = arith.addf %28, %29 : vector<8x16x256xf32>
    %31 = math.tanh %30 : vector<8x16x256xf32>
    %32 = vector.shape_cast %12 : vector<1x256xf32> to vector<1x1x256xf32>
    %33 = vector.broadcast %32 : vector<1x1x256xf32> to vector<8x16x256xf32>
    %34 = arith.mulf %31, %33 : vector<8x16x256xf32>
    %cst_24 = arith.constant dense<0.000000e+00> : vector<8x16xf32>
    %35 = vector.multi_reduction <add>, %34, %cst_24 [2] : vector<8x16x256xf32> to vector<8x16xf32>
    %36 = vector.broadcast %13 : vector<1x1xf32> to vector<8x16xf32>
    %37 = arith.addf %35, %36 : vector<8x16xf32>
    %c0_25 = arith.constant 0 : index
    %c0_26 = arith.constant 0 : index
    %c0_27 = arith.constant 0 : index
    %38 = vector.load %arg3[%c0_25, %c0_26, %c0_27] : memref<1x8x1xf32, #tpu.memory_space<vmem>>, vector<1x8x1xf32>
    %39 = vector.shape_cast %38 : vector<1x8x1xf32> to vector<8x1xf32>
    %cst_28 = arith.constant 1.000000e+00 : f32
    %40 = vector.broadcast %cst_28 : f32 to vector<8x1xf32>
    %41 = arith.subf %40, %39 : vector<8x1xf32>
    %cst_29 = arith.constant 1.000000e+10 : f32
    %42 = vector.broadcast %cst_29 : f32 to vector<8x1xf32>
    %43 = arith.mulf %41, %42 : vector<8x1xf32>
    %44 = vector.broadcast %43 : vector<8x1xf32> to vector<8x16xf32>
    %45 = arith.subf %37, %44 : vector<8x16xf32>
    %c0_30 = arith.constant 0 : index
    %c0_31 = arith.constant 0 : index
    %c0_32 = arith.constant 0 : index
    %46 = vector.load %arg11[%c0_30, %c0_31, %c0_32] : memref<1x8x16xf32, #tpu.memory_space<vmem>>, vector<1x8x16xf32>
    %47 = vector.shape_cast %46 : vector<1x8x16xf32> to vector<8x16xf32>
    %48 = vector.shape_cast %45 : vector<8x16xf32> to vector<1x8x16xf32>
    tpu.vector_store %arg11[%c0_30, %c0_31, %c0_32], %48 {strides = array<i32>} : memref<1x8x16xf32, #tpu.memory_space<vmem>>, vector<1x8x16xf32>,
    return
  }
  func.func @transform_0(%arg0: i32) -> (i32, i32, i32) {
    %c0_i32 = arith.constant 0 : i32
    %c0_i32_0 = arith.constant 0 : i32
    %c0_i32_1 = arith.constant 0 : i32
    return %arg0, %c0_i32, %c0_i32_0 : i32, i32, i32
  }
  func.func @transform_1(%arg0: i32) -> (i32, i32, i32) {
    %c0_i32 = arith.constant 0 : i32
    %c0_i32_0 = arith.constant 0 : i32
    %c0_i32_1 = arith.constant 0 : i32
    return %arg0, %c0_i32, %c0_i32_0 : i32, i32, i32
  }
  func.func @transform_2(%arg0: i32) -> (i32, i32, i32) {
    %c0_i32 = arith.constant 0 : i32
    %c0_i32_0 = arith.constant 0 : i32
    %c0_i32_1 = arith.constant 0 : i32
    return %arg0, %c0_i32, %c0_i32_0 : i32, i32, i32
  }
  func.func @transform_3(%arg0: i32) -> (i32, i32) {
    %c0_i32 = arith.constant 0 : i32
    %c0_i32_0 = arith.constant 0 : i32
    %c0_i32_1 = arith.constant 0 : i32
    return %c0_i32, %c0_i32_0 : i32, i32
  }
  func.func @transform_4(%arg0: i32) -> (i32, i32) {
    %c0_i32 = arith.constant 0 : i32
    %c0_i32_0 = arith.constant 0 : i32
    %c0_i32_1 = arith.constant 0 : i32
    return %c0_i32, %c0_i32_0 : i32, i32
  }
  func.func @transform_5(%arg0: i32) -> (i32, i32) {
    %c0_i32 = arith.constant 0 : i32
    %c0_i32_0 = arith.constant 0 : i32
    %c0_i32_1 = arith.constant 0 : i32
    return %c0_i32, %c0_i32_0 : i32, i32
  }
  func.func @transform_6(%arg0: i32) -> (i32, i32) {
    %c0_i32 = arith.constant 0 : i32
    %c0_i32_0 = arith.constant 0 : i32
    %c0_i32_1 = arith.constant 0 : i32
    return %c0_i32, %c0_i32_0 : i32, i32
  }
  func.func @transform_7(%arg0: i32) -> (i32, i32) {
    %c0_i32 = arith.constant 0 : i32
    %c0_i32_0 = arith.constant 0 : i32
    %c0_i32_1 = arith.constant 0 : i32
    return %c0_i32, %c0_i32_0 : i32, i32
  }
  func.func @transform_8(%arg0: i32) -> (i32, i32) {
    %c0_i32 = arith.constant 0 : i32
    %c0_i32_0 = arith.constant 0 : i32
    %c0_i32_1 = arith.constant 0 : i32
    return %c0_i32, %c0_i32_0 : i32, i32
  }
  func.func @transform_9(%arg0: i32) -> (i32, i32, i32) {
    %c0_i32 = arith.constant 0 : i32
    %c0_i32_0 = arith.constant 0 : i32
    %c0_i32_1 = arith.constant 0 : i32
    return %arg0, %c0_i32, %c0_i32_0 : i32, i32, i32
  }
  func.func @transform_10(%arg0: i32) -> (i32, i32, i32) {
    %c0_i32 = arith.constant 0 : i32
    %c0_i32_0 = arith.constant 0 : i32
    %c0_i32_1 = arith.constant 0 : i32
    return %arg0, %c0_i32, %c0_i32_0 : i32, i32, i32
  }
  func.func @transform_11(%arg0: i32) -> (i32, i32, i32) {
    %c0_i32 = arith.constant 0 : i32
    %c0_i32_0 = arith.constant 0 : i32
    %c0_i32_1 = arith.constant 0 : i32
    return %arg0, %c0_i32, %c0_i32_0 : i32, i32, i32
  }
}

</mosaic_0001>

<bundles_post_ra>
// kernel: model_forward.1
= control target key start
LH: loop header
LB: loop body
LE: loop exit
PB: predicated region body
PF: predicated region fallthrough
CT: control target
= control target key end

     0   :  { %s2227_s0 = inlined_call_operand.vmem [shape: f32[2,16,32], index: 0, kind: input, shape index: {}]   ;;  %s2228_s1 = inlined_call_operand.vmem [shape: f32[2,8,32], index: 1, kind: input, shape index: {}]   ;;  %s2229_s2 = inlined_call_operand.vmem [shape: f32[2,8,1], index: 2, kind: input, shape index: {}]   ;;  %s2230_s3 = inlined_call_operand.vmem [shape: f32[32,261], index: 3, kind: input, shape index: {}]   ;;  %s2231_s4 = inlined_call_operand.vmem [shape: f32[1,261], index: 4, kind: input, shape index: {}]   ;;  %s2232_s5 = inlined_call_operand.vmem [shape: f32[32,263], index: 5, kind: input, shape index: {}]   ;;  %s2233_s6 = inlined_call_operand.vmem [shape: f32[1,263], index: 6, kind: input, shape index: {}]   ;;  %s2234_s7 = inlined_call_operand.vmem [shape: f32[1,256], index: 7, kind: input, shape index: {}]   ;;  %s2235_s8 = inlined_call_operand.<no memory space> [shape: f32[1,1], index: 8, kind: input, shape index: {}]   ;;  %s2236_s9 = inlined_call_operand.vmem [shape: f32[2,8,7], index: 9, kind: output, shape index: {0}]   ;;  %s2237_s10 = inlined_call_operand.hbm [shape: f32[2,8,16], index: 10, kind: output, shape index: {1}]   ;;  %s2238_s11 = inlined_call_operand.vmem [shape: f32[2,16,5], index: 11, kind: output, shape index: {2}]  }
   0x1   :  { %v17_v0 = vstv %s2235_s8 }
   0x2   :  { %18 = vst [vmem:[#allocation2] sm:$0x1] %v17_v0 }
   0x3   :  { %19 = vsyncpa [#allocation4], 0 }
   0x4   :  { %21 = vsyncpa [#allocation4 + $0x1], 0  ;;  %s1839_s19 = smov 0   ;;  %s1841_s20 = smov 0  }
   0x5   :  { %s1843_s21 = smov 0   ;;  %s1845_s22 = smov 0  }
   0x6 LB: > { %2240 = sst [smem:[#allocation6_spill]] %s1764_s21  ;;  %s1860_s8 = sadd.s32 4294967295, %s1768_s22   ;;  %s1768_s22 = sphi %s1845_s22, %s2249_s22   ;;  %s1764_s21 = sphi %s1843_s21, %s2248_s21   ;;  %s1760_s20 = sphi %s1841_s20, %s2247_s20   ;;  %s1756_s19 = sphi %s1839_s19, %s2246_s19  }
   0x7   : > { %s1508_s23 = sadd.s32 4294967294, %s1768_s22   ;;  %s1864_s24 = sadd.s32 1, %s1768_s22  }
   0x8   : > { %s264_s25 = sadd.s32 1, %s1764_s21  ;;  %s261_s26 = ssub.s32 %s1768_s22, %s1864_s24 }
   0x9   : > { %p274_p0 = scmp.ne.s32.totalorder %s1764_s21, %s1760_s20  ;;  %p262_p1 = scmp.eq.s32.totalorder %s261_s26, 0 }
   0xa   : > { %p275_p2 = scmp.eq.s32.totalorder %s1860_s8, 1  ;;  %p280_p3 = scmp.ne.s32.totalorder %s1760_s20, %s1756_s19 }
   0xb   : > { %p281_p4 = scmp.eq.s32.totalorder %s1508_s23, 1  ;;  %p1511_p7 = scmp.ge.s32.totalorder %s1768_s22, 1 }
   0xc   : > { %s1875_s27 = scalar_select %p262_p1, %s1764_s21, %s264_s25  }
   0xd   : > { %p1877_p5 = por %p275_p2, %p274_p0  ;;  %p1881_p6 = por %p281_p4, %p280_p3 }
   0xe   : > { %2241 = sst [smem:[#allocation7_spill]] %s1875_s27  ;;  %p365_p8 = scmp.lt.s32.totalorder %s1768_s22, 3 }
  0x10   : > { %p366_p9 = pnand %p1511_p7, %p365_p8 }
  0x11   : > { %v447_v1 = vld [vmem:[%s2230_s3 + $0x8] sm:$0xff] (!%p366_p9)  ;;  %v450_v2 = vld [vmem:[%s2230_s3 + $0x20] sm:$0xff] (!%p366_p9)  ;;  %p422_p10 = scmp.lt.s32.totalorder (!%p366_p9), %s1860_s8, 1  ;;  %v449_v5 = vld [vmem:[%s2230_s3 + $0x18] sm:$0xff] (!%p366_p9)  ;;  %v1770_v8 = vmov (!%p366_p9), 0.0   ;;  %vm475_vm0 = vcmask (!%p366_p9), 261120   ;;  %v460_v30 = vlaneseq (!%p366_p9) }
  0x12   : > { %369 = sbr.rel (%p366_p9) target bundleno = 656 (0x290), region = 56  ;;  %v446_v3 = vld [vmem:[%s2230_s3] sm:$0xff] (!%p366_p9)  ;;  %v1566_v4 = vpack.c.bf16 (!%p366_p9), %v450_v2, %v447_v1  ;;  %v453_v6 = vld [vmem:[%s2230_s3 + $0x38] sm:$0xff] (!%p366_p9)  ;;  %v456_v7 = vld [vmem:[%s2230_s3 + $0x50] sm:$0xff] (!%p366_p9)  ;;  %546 = vmatprep.mubr.f32.mxu0 (!%p366_p9), %v1770_v8  ;;  %v1771_v29 = vmov (!%p366_p9), 0   ;;  %v1773_v49 = vmov (!%p366_p9), 0.0|0.0  }
  0x13   : > { %v1568_v9 = vpack.c.bf16 (!%p366_p9), %v449_v5, %v446_v3  ;;  %v1570_v10 = vpack.c.bf16 (!%p366_p9), %v456_v7, %v453_v6  ;;  %v452_v11 = vld [vmem:[%s2230_s3 + $0x30] sm:$0xff] (!%p366_p9)  ;;  %v455_v12 = vld [vmem:[%s2230_s3 + $0x48] sm:$0xff] (!%p366_p9)  ;;  %v644_v14 = vld [vmem:[%s2232_s5 + $0x20] sm:$0xff] (!%p366_p9)  ;;  %1641 = vset.pattern.permute.xlu1 (!%p366_p9), %v1771_v29  ;;  %1640 = vset.pattern.permute.xlu0 (!%p366_p9), %v1771_v29  ;;  %v1972_v37 = vshrl.u32 (!%p366_p9), %v460_v30, 7  ;;  %v1772_v43 = vmov (!%p366_p9), 1966171168  }
  0x14   : > { %v641_v13 = vld [vmem:[%s2232_s5 + $0x8] sm:$0xff] (!%p366_p9)  ;;  %1567 = vmatprep.subr.bf16.mxu0 (!%p366_p9), %v1566_v4  ;;  %v1572_v15 = vpack.c.bf16 (!%p366_p9), %v455_v12, %v452_v11  ;;  %v640_v17 = vld [vmem:[%s2232_s5] sm:$0xff] (!%p366_p9)  ;;  %v643_v18 = vld [vmem:[%s2232_s5 + $0x18] sm:$0xff] (!%p366_p9)  ;;  %v820_v44 = vunpack.c.l.s4 (!%p366_p9), %v1772_v43  ;;  %vm1774_vm1 = vmmov (!%p366_p9), 0   ;;  %vm634_vm2 = vcmask (!%p366_p9), 39936  }
  0x15   : > { %1569 = vmatpush1.bf16.msra.mxu0 (!%p366_p9), %v1568_v9  ;;  %v1582_v16 = vpack.c.bf16 (!%p366_p9), %v644_v14, %v641_v13  ;;  %v647_v20 = vld [vmem:[%s2232_s5 + $0x38] sm:$0xff] (!%p366_p9)  ;;  %v650_v21 = vld [vmem:[%s2232_s5 + $0x50] sm:$0xff] (!%p366_p9)  ;;  %v1584_v22 = vpack.c.bf16 (!%p366_p9), %v643_v18, %v640_v17  ;;  %v649_v25 = vld [vmem:[%s2232_s5 + $0x48] sm:$0xff] (!%p366_p9)  ;;  %v1986_v45 = vsub.s32 (!%p366_p9), 0, %v1972_v37  ;;  %v1989_v47 = vsub.s32 (!%p366_p9), 1, %v1972_v37 }
  0x16   : > { %1571 = vmatprep.subr.bf16.mxu0 (!%p366_p9), %v1570_v10  ;;  %v1586_v23 = vpack.c.bf16 (!%p366_p9), %v650_v21, %v647_v20  ;;  %v646_v24 = vld [vmem:[%s2232_s5 + $0x30] sm:$0xff] (!%p366_p9)  ;;  %v451_v32 = vld [vmem:[%s2230_s3 + $0x28] sm:$0xff] (!%p366_p9)  ;;  %v454_v33 = vld [vmem:[%s2230_s3 + $0x40] sm:$0xff] (!%p366_p9)  ;;  %v821_v55 = vunpack.c.0.s8 (!%p366_p9), %v820_v44  ;;  %vm813_vm3 = vcmask (!%p366_p9), 56320   ;;  %vm1265_vm4 = vcmask (!%p366_p9), 130112  }
  0x17   : > { %v1588_v27 = vpack.c.bf16 (!%p366_p9), %v649_v25, %v646_v24  ;;  %v448_v31 = vld [vmem:[%s2230_s3 + $0x10] sm:$0xff] (!%p366_p9)  ;;  %v457_v35 = vld [vmem:[%s2230_s3 + $0x58] sm:$0xff] (!%p366_p9)  ;;  %v645_v40 = vld [vmem:[%s2232_s5 + $0x28] sm:$0xff] (!%p366_p9)  ;;  %vm1330_vm5 = vcmask (!%p366_p9), 1041409   ;;  %vm1332_vm6 = vcmask (!%p366_p9), 1042434   ;;  %vm1334_vm7 = vcmask (!%p366_p9), 1043459  }
  0x18   : > { %v1574_v34 = vpack.c.bf16 (!%p366_p9), %v451_v32, %v448_v31  ;;  %v1578_v36 = vpack.c.bf16 (!%p366_p9), %v457_v35, %v454_v33  ;;  %v642_v39 = vld [vmem:[%s2232_s5 + $0x10] sm:$0xff] (!%p366_p9)  ;;  %v1983_v42 = vld [vmem:[%s2233_s6] sm:$0x7] (!%p366_p9)  ;;  %v651_v51 = vld [vmem:[%s2232_s5 + $0x58] sm:$0xff] (!%p366_p9)  ;;  %v824_v62 = vsub.s32 (!%p366_p9), %v821_v55, %v1972_v37  ;;  %vm1336_vm8 = vcmask (!%p366_p9), 1044484  }
  0x19   : > { %s1914_s16 = scalar_select %p422_p10, %s1860_s8, 1  ;;  %1573 = vmatpush1.bf16.msra.mxu0 %v1572_v15  ;;  %v1591_v46 = vpack.c.bf16 %v645_v40, %v642_v39  ;;  %v648_v50 = vld [vmem:[%s2232_s5 + $0x40] sm:$0xff]  ;;  %v657_v53 = vrot.slane %v1983_v42, %v1986_v45  ;;  %v661_v54 = vrot.slane %v1983_v42, %v1989_v47  ;;  %vm1338_vm9 = vcmask 1045509  }
  0x1a   : > { %1583 = vmatprep.subr.bf16.mxu0 %v1582_v16  ;;  %1575 = vmatprep.subr.bf16.mxu1 %v1574_v34  ;;  %v1594_v56 = vpack.c.bf16 %v651_v51, %v648_v50  ;;  %v2006_v60 = vld [vmem:[%s2231_s4] sm:$0x7]  ;;  %vm1340_vm10 = vcmask 1046534   ;;  %vm1342_vm11 = vcmask 1047559   ;;  %vm1345_vm12 = vcmask 130048  }
  0x1b   : > { %s1531_s26 = sshll.u32 %s1914_s16, 4  ;;  %s1948_s17 = sshll.u32 %s1914_s16, 3  ;;  %1577 = vmatpush3.bf16.msra.mxu1 %v1574_v34  ;;  %v463_v1 = vrot.slane %v2006_v60, %v1986_v45  ;;  %v467_v2 = vrot.slane %v2006_v60, %v1989_v47 }
  0x1c   : > { %s426_s13 = scalar_lea.vmem %s2227_s0, %s1531_s26  ;;  %s430_s18 = scalar_lea.vmem %s2228_s1, %s1948_s17  ;;  %1579 = vmatprep.subr.bf16.mxu1 %v1578_v36 }
  0x1d   : > { %v444_v19 = vld [vmem:[%s426_s13] sm:$0xff]  ;;  %v445_v26 = vld [vmem:[%s426_s13 + $0x8] sm:$0xff]  ;;  %s434_s12 = scalar_lea.vmem %s2229_s2, %s1948_s17  ;;  %s443_s21 = scalar_lea.vmem %s2238_s11, %s1531_s26 }
  0x1e   : > { %1552 = vmatprep.mubr.msk.f32.mxu1 %vm475_vm0, %v444_v19  ;;  %1520 = vmatmul.mubr.msk.f32.vlgmr.msra.gmra.mrb[0].mxu0 %vm475_vm0, %v444_v19  ;;  %v639_v28 = vld [vmem:[%s430_s18] sm:$0xff]  ;;  %s438_s23 = scalar_lea.vmem %s2236_s9, %s1948_s17  ;;  %s412_s16 = sand.u32 1, %s1760_s20  }
  0x1f   : > { %1585 = vmatpush1.bf16.msra.mxu0 %v1584_v22  ;;  %552 = vmatprep.mubr.f32.mxu0 %v1770_v8  ;;  %s2164_s26 = sshll.u32 %s412_s16, 3  ;;  %s1528_s17 = sshll.u32 %s1860_s8, 7 }
  0x20   : > { %1587 = vmatprep.subr.bf16.mxu0 %v1586_v23  ;;  %1581 = vmatpush3.bf16.msra.mxu1 %v1578_v36  ;;  %s414_s13 = scalar_lea.vmem [#allocation3], %s2164_s26  ;;  %s1352_s14 = scalar_lea.sflag [#allocation4], %s412_s16 }
  0x21   : > { %1590 = vmatprep.subr.bf16.mxu1 %v1773_v49  ;;  %s1373_s25 = sshll.u32 %s414_s13, 4  ;;  %s2185_s25 = int_to_ptr.vmem [resolvable:$true] %s1373_s25 }
  0x22   : > { %1521 = vmatmul.mubr.msk.f32.gmra.mrb[2].mxu0 %vm475_vm0, %v445_v26  ;;  %s1706_s15 = scalar_lea.vmem %s2185_s25, 128 }
  0x23   : > { %1589 = vmatpush1.bf16.msra.mxu0 %v1588_v27  ;;  %736 = vmatprep.mubr.f32.mxu0 %v1770_v8  ;;  %p1707_p11 = scmp.ne.s32.totalorder %s2185_s25, %s1706_s15 }
  0x24   : > { %1553 = vmatmul.mubr.msk.f32.vlgmr.msra.gmra.mrb[0].mxu1 %vm475_vm0, %v445_v26 }
  0x25   : > { %1592 = vmatpush3.bf16.msra.mxu1 %v1591_v46  ;;  %1563 = vmatprep.mubr.msk.f32.mxu1 %vm1774_vm1, %v1770_v8  ;;  %p1708_p12 = pnand %p1707_p11, %p1877_p5 }
  0x26   : > { %1524 = vmatmul.mubr.msk.f32.vlgmr.msra.gmra.mrb[4].mxu0 %vm475_vm0, %v639_v28  ;;  %1593 = vmatprep.subr.bf16.mxu1 %v1773_v49 }
  0x27   : > { %p1709_p13 = pneg %p1708_p12 }
  0x29   : > { %1595 = vmatpush3.bf16.msra.mxu1 %v1594_v56 }
  0x2c   : > { %1564 = vmatmul.mubr.msk.f32.vlgmr.msra.gmra.mrb[2].mxu1 %vm475_vm0, %v639_v28 }
  0xf1   : > { %v548_v38 = vpop.f32.mrb[0].mxu0 }
  0xf2   : > { %v550_v41 = vpop.f32.mrb[1].mxu0  ;;  %v2014_v9 = vadd.f32 %v548_v38, %v463_v1 }
  0xf3   : > { %v2016_v10 = vadd.f32 %v550_v41, %v467_v2 }
  0xf5   : > { %v554_v48 = vpop.f32.mrb[2].mxu0 }
  0xf6   : > { %v556_v52 = vpop.f32.mrb[3].mxu0  ;;  %v2018_v11 = vadd.f32 %v554_v48, %v463_v1 }
  0xf7   : > { %v2020_v12 = vadd.f32 %v556_v52, %v467_v2 }
  0xf9   : > { %v738_v57 = vpop.f32.mrb[4].mxu0 }
  0xfa   : > { %v739_v58 = vadd.f32 %v738_v57, %v657_v53  ;;  %v740_v59 = vpop.f32.mrb[5].mxu0 }
  0xfb   : > { %v741_v61 = vadd.f32 %v740_v59, %v661_v54 }
  0xfd   : > { %v817_v63 = vcombine.low %v739_v58, %v741_v61  ;;  %v818_v0 = vcombine.high %v739_v58, %v741_v61 }
  0xff   : > { %v825_v3 = vrot.slane %v817_v63, %v824_v62  ;;  %v832_v4 = vrot.slane %v818_v0, %v824_v62 }
 0x101   : > { %v833_v5 = vcombine.high %v825_v3, %v825_v3  ;;  %v834_v6 = vcombine.high %v832_v4, %v832_v4  ;;  %v841_v7 = vrot.slane %v825_v3, %v824_v62  ;;  %v848_v8 = vrot.slane %v832_v4, %v824_v62 }
 0x103   : > { %v855_v13 = vrot.slane %v833_v5, %v824_v62  ;;  %v862_v14 = vrot.slane %v834_v6, %v824_v62  ;;  %v863_v15 = vcombine.high %v841_v7, %v841_v7  ;;  %v864_v16 = vcombine.high %v848_v8, %v848_v8  ;;  %v637_v62 = vld [vmem:[%s2234_s7] sm:$0x3] }
 0x104   : > { %v870_v17 = vrot.slane %v841_v7, %v1986_v45  ;;  %v874_v18 = vrot.slane %v841_v7, %v1989_v47  ;;  %v902_v19 = vrot.slane %v848_v8, %v1986_v45  ;;  %v906_v20 = vrot.slane %v848_v8, %v1989_v47 }
 0x105   : > { %v865_v21 = vcombine.high %v855_v13, %v855_v13  ;;  %v866_v22 = vcombine.high %v862_v14, %v862_v14  ;;  %v878_v23 = vrot.slane %v855_v13, %v1986_v45  ;;  %v882_v24 = vrot.slane %v855_v13, %v1989_v47 }
 0x106   : > { %v886_v25 = vrot.slane %v863_v15, %v1986_v45  ;;  %v890_v26 = vrot.slane %v863_v15, %v1989_v47  ;;  %v910_v27 = vrot.slane %v862_v14, %v1986_v45  ;;  %v914_v28 = vrot.slane %v862_v14, %v1989_v47 }
 0x107   : > { %v894_v29 = vrot.slane %v865_v21, %v1986_v45  ;;  %v898_v31 = vrot.slane %v865_v21, %v1989_v47  ;;  %v918_v32 = vrot.slane %v864_v16, %v1986_v45  ;;  %v922_v33 = vrot.slane %v864_v16, %v1989_v47 }
 0x108   : > { %v926_v34 = vrot.slane %v866_v22, %v1986_v45  ;;  %v930_v35 = vrot.slane %v866_v22, %v1989_v47  ;;  %v947_v36 = vadd.f32 %v870_v17, %v2014_v9  ;;  %v948_v38 = vadd.f32 %v874_v18, %v2016_v10 }
 0x109   : > { %v949_v39 = vadd.f32 %v870_v17, %v2018_v11  ;;  %v950_v40 = vadd.f32 %v874_v18, %v2020_v12  ;;  %v963_v41 = vadd.f32 %v902_v19, %v2014_v9  ;;  %v964_v43 = vadd.f32 %v906_v20, %v2016_v10 }
 0x10a   : > { %v965_v44 = vadd.f32 %v902_v19, %v2018_v11  ;;  %v966_v46 = vadd.f32 %v906_v20, %v2020_v12  ;;  %1642 = vtanh.f32 %v947_v36  ;;  %v951_v48 = vadd.f32 %v878_v23, %v2014_v9 }
 0x10b   : > { %1644 = vtanh.f32 %v949_v39  ;;  %v952_v49 = vadd.f32 %v882_v24, %v2016_v10  ;;  %v953_v50 = vadd.f32 %v878_v23, %v2018_v11  ;;  %v954_v51 = vadd.f32 %v882_v24, %v2020_v12 }
 0x10c   : > { %1646 = vtanh.f32 %v950_v40  ;;  %v957_v52 = vadd.f32 %v886_v25, %v2018_v11  ;;  %v958_v53 = vadd.f32 %v890_v26, %v2020_v12  ;;  %v955_v54 = vadd.f32 %v886_v25, %v2014_v9 }
 0x10d   : > { %1648 = vtanh.f32 %v963_v41  ;;  %v956_v55 = vadd.f32 %v890_v26, %v2016_v10  ;;  %v969_v56 = vadd.f32 %v910_v27, %v2018_v11  ;;  %v970_v57 = vadd.f32 %v914_v28, %v2020_v12 }
 0x10e   : > { %1650 = vtanh.f32 %v964_v43  ;;  %v967_v58 = vadd.f32 %v910_v27, %v2014_v9  ;;  %v968_v59 = vadd.f32 %v914_v28, %v2016_v10  ;;  %v973_v61 = vadd.f32 %v918_v32, %v2018_v11 }
 0x10f   : > { %1652 = vtanh.f32 %v965_v44  ;;  %v974_v63 = vadd.f32 %v922_v33, %v2020_v12  ;;  %v971_v0 = vadd.f32 %v918_v32, %v2014_v9  ;;  %v972_v1 = vadd.f32 %v922_v33, %v2016_v10 }
 0x110   : > { %1654 = vtanh.f32 %v966_v46  ;;  %v2066_v2 = vadd.f32 %v894_v29, %v2018_v11  ;;  %v2069_v3 = vadd.f32 %v898_v31, %v2020_v12  ;;  %v2072_v4 = vadd.f32 %v894_v29, %v2014_v9 }
 0x111   : > { %1656 = vtanh.f32 %v948_v38  ;;  %v2075_v5 = vadd.f32 %v898_v31, %v2016_v10  ;;  %v2078_v6 = vadd.f32 %v926_v34, %v2014_v9  ;;  %v2081_v7 = vadd.f32 %v930_v35, %v2016_v10 }
 0x112   : > { %v2084_v8 = vrot.slane %v637_v62, %v1986_v45  ;;  %1658 = vtanh.f32 %v951_v48  ;;  %v2087_v13 = vadd.f32 %v926_v34, %v2018_v11  ;;  %v2090_v14 = vadd.f32 %v930_v35, %v2020_v12 }
 0x113   : > { %v2093_v15 = vrot.slane %v637_v62, %v1989_v47  ;;  %1660 = vtanh.f32 %v952_v49 }
 0x114   : > { %v1643_v16 = vpop.eup %1642  ;;  %1662 = vtanh.f32 %v953_v50 }
 0x115   : > { %v1645_v9 = vpop.eup %1644  ;;  %1664 = vtanh.f32 %v954_v51  ;;  %v1022_v25 = vmul.f32 %v1643_v16, %v2084_v8 }
 0x116   : > { %v1647_v10 = vpop.eup %1646  ;;  %v1024_v17 = vmul.f32 %v1645_v9, %v2084_v8  ;;  %1666 = vtanh.f32 %v957_v52 }
 0x117   : > { %v1649_v18 = vpop.eup %1648  ;;  %v1025_v19 = vmul.f32 %v1647_v10, %v2093_v15  ;;  %1668 = vtanh.f32 %v958_v53 }
 0x118   : > { %v1651_v11 = vpop.eup %1650  ;;  %v1038_v12 = vmul.f32 %v1649_v18, %v2084_v8  ;;  %1670 = vtanh.f32 %v955_v54 }
 0x119   : > { %v1653_v20 = vpop.eup %1652  ;;  %v1057_v21 = vadd.f32 %v1025_v19, %v1024_v17  ;;  %v1039_v22 = vmul.f32 %v1651_v11, %v2093_v15  ;;  %1672 = vtanh.f32 %v956_v55 }
 0x11a   : > { %v1655_v23 = vpop.eup %1654  ;;  %v1040_v24 = vmul.f32 %v1653_v20, %v2084_v8  ;;  %1674 = vtanh.f32 %v969_v56 }
 0x11b   : > { %v1657_v26 = vpop.eup %1656  ;;  %v1041_v27 = vmul.f32 %v1655_v23, %v2093_v15  ;;  %v1078_v28 = vadd.f32 %v1039_v22, %v1038_v12  ;;  %1676 = vtanh.f32 %v970_v57 }
 0x11c   : > { %v1659_v29 = vpop.eup %1658  ;;  %v1023_v31 = vmul.f32 %v1657_v26, %v2093_v15  ;;  %1678 = vtanh.f32 %v967_v58 }
 0x11d   : > { %v1661_v32 = vpop.eup %1660  ;;  %v1081_v33 = vadd.f32 %v1041_v27, %v1040_v24  ;;  %v1026_v34 = vmul.f32 %v1659_v29, %v2084_v8  ;;  %1680 = vtanh.f32 %v968_v59 }
 0x11e   : > { %v1663_v35 = vpop.eup %1662  ;;  %v1054_v36 = vadd.f32 %v1023_v31, %v1022_v25  ;;  %v1027_v38 = vmul.f32 %v1661_v32, %v2093_v15  ;;  %1682 = vtanh.f32 %v973_v61 }
 0x11f   : > { %v1665_v39 = vpop.eup %1664  ;;  %1082 = vadd.xlane.f32.xlu1 %v1081_v33  ;;  %v1028_v40 = vmul.f32 %v1663_v35, %v2084_v8  ;;  %1684 = vtanh.f32 %v974_v63 }
 0x120   : > { %v1667_v41 = vpop.eup %1666  ;;  %1055 = vadd.xlane.f32.xlu0 %v1054_v36  ;;  %v1060_v43 = vadd.f32 %v1027_v38, %v1026_v34  ;;  %v1029_v44 = vmul.f32 %v1665_v39, %v2093_v15  ;;  %1686 = vtanh.f32 %v971_v0  ;;  %v1127_v38 = vld [vmem:[%s434_s12] sm:$0xff]  ;;  %s2183_s12 = scalar_lea.hbm %s2237_s10, %s1528_s17 }
 0x121   : > { %v1669_v46 = vpop.eup %1668  ;;  %v1032_v48 = vmul.f32 %v1667_v41, %v2084_v8  ;;  %1688 = vtanh.f32 %v972_v1  ;;  %v1128_v39 = vsub.f32 1.0, %v1127_v38  ;;  %v1526_v41 = vld [vmem:[#allocation2] ss:$0 sm:$0xff]  ;;  %v1164_v38 = vsub.s32 7, %v1972_v37 }
 0x122   : > { %v1671_v49 = vpop.eup %1670  ;;  %v1063_v50 = vadd.f32 %v1029_v44, %v1028_v40  ;;  %v1033_v51 = vmul.f32 %v1669_v46, %v2093_v15  ;;  %1690 = vtanh.f32 %v2066_v2 }
 0x123   : > { %v1673_v52 = vpop.eup %1672  ;;  %1061 = vadd.xlane.f32.xlu1 %v1060_v43  ;;  %v1030_v53 = vmul.f32 %v1671_v49, %v2084_v8  ;;  %1692 = vtanh.f32 %v2069_v3  ;;  %v1129_v40 = vmul.f32 1e+10, %v1128_v39 }
 0x124   : > { %v1675_v54 = vpop.eup %1674  ;;  %1058 = vadd.xlane.f32.xlu0 %v1057_v21  ;;  %v1069_v55 = vadd.f32 %v1033_v51, %v1032_v48  ;;  %v1031_v56 = vmul.f32 %v1673_v52, %v2093_v15  ;;  %1694 = vtanh.f32 %v2072_v4 }
 0x125   : > { %v1677_v57 = vpop.eup %1676  ;;  %v1044_v58 = vmul.f32 %v1675_v54, %v2084_v8  ;;  %1696 = vtanh.f32 %v2075_v5 }
 0x126   : > { %v1679_v59 = vpop.eup %1678  ;;  %v1066_v61 = vadd.f32 %v1031_v56, %v1030_v53  ;;  %v1045_v62 = vmul.f32 %v1677_v57, %v2093_v15  ;;  %1698 = vtanh.f32 %v2078_v6 }
 0x127   : > { %v1681_v63 = vpop.eup %1680  ;;  %1064 = vadd.xlane.f32.xlu1 %v1063_v50  ;;  %v1042_v0 = vmul.f32 %v1679_v59, %v2084_v8  ;;  %1700 = vtanh.f32 %v2081_v7 }
 0x128   : > { %v1683_v1 = vpop.eup %1682  ;;  %1079 = vadd.xlane.f32.xlu0 %v1078_v28  ;;  %v1087_v2 = vadd.f32 %v1045_v62, %v1044_v58  ;;  %v1043_v3 = vmul.f32 %v1681_v63, %v2093_v15  ;;  %1702 = vtanh.f32 %v2087_v13  ;;  %v1152_v58 = vsub.s32 4, %v1972_v37 }
 0x129   : > { %v1685_v4 = vpop.eup %1684  ;;  %v1048_v5 = vmul.f32 %v1683_v1, %v2084_v8  ;;  %1704 = vtanh.f32 %v2090_v14  ;;  %v1156_v62 = vsub.s32 5, %v1972_v37 }
 0x12a   : > { %v1687_v16 = vpop.eup %1686  ;;  %v1084_v6 = vadd.f32 %v1043_v3, %v1042_v0  ;;  %v1049_v9 = vmul.f32 %v1685_v4, %v2093_v15 }
 0x12b   : > { %v1689_v10 = vpop.eup %1688  ;;  %1070 = vadd.xlane.f32.xlu1 %v1069_v55  ;;  %v1046_v7 = vmul.f32 %v1687_v16, %v2084_v8 }
 0x12c   : > { %v1691_v17 = vpop.eup %1690  ;;  %1067 = vadd.xlane.f32.xlu0 %v1066_v61  ;;  %v1093_v18 = vadd.f32 %v1049_v9, %v1048_v5  ;;  %v1047_v19 = vmul.f32 %v1689_v10, %v2093_v15  ;;  %v1160_v9 = vsub.s32 6, %v1972_v37 }
 0x12d   : > { %v1693_v11 = vpop.eup %1692  ;;  %v1036_v13 = vmul.f32 %v1691_v17, %v2084_v8 }
 0x12e   : > { %v1695_v12 = vpop.eup %1694  ;;  %v1090_v20 = vadd.f32 %v1047_v19, %v1046_v7  ;;  %v1037_v14 = vmul.f32 %v1693_v11, %v2093_v15  ;;  %v1148_v11 = vsub.s32 3, %v1972_v37 }
 0x12f   : > { %v1697_v21 = vpop.eup %1696  ;;  %1088 = vadd.xlane.f32.xlu1 %v1087_v2  ;;  %v1034_v22 = vmul.f32 %v1695_v12, %v2084_v8 }
 0x130   : > { %v1699_v23 = vpop.eup %1698  ;;  %1085 = vadd.xlane.f32.xlu0 %v1084_v6  ;;  %v1075_v24 = vadd.f32 %v1037_v14, %v1036_v13  ;;  %v1035_v25 = vmul.f32 %v1697_v21, %v2093_v15 }
 0x131   : > { %v1701_v26 = vpop.eup %1700  ;;  %v1050_v27 = vmul.f32 %v1699_v23, %v2084_v8 }
 0x132   : > { %v1703_v28 = vpop.eup %1702  ;;  %v1072_v29 = vadd.f32 %v1035_v25, %v1034_v22  ;;  %v1051_v31 = vmul.f32 %v1701_v26, %v2093_v15  ;;  %v470_v25 = vsub.s32 2, %v1972_v37 }
 0x133   : > { %v1705_v32 = vpop.eup %1704  ;;  %1094 = vadd.xlane.f32.xlu1 %v1093_v18  ;;  %v1052_v33 = vmul.f32 %v1703_v28, %v2084_v8 }
 0x134   : > { %1091 = vadd.xlane.f32.xlu0 %v1090_v20  ;;  %v1096_v34 = vadd.f32 %v1051_v31, %v1050_v27  ;;  %v1053_v35 = vmul.f32 %v1705_v32, %v2093_v15 }
 0x136   : > { %v1099_v36 = vadd.f32 %v1053_v35, %v1052_v33 }
 0x137   : > { %1076 = vadd.xlane.f32.xlu1 %v1075_v24 }
 0x138   : > { %1073 = vadd.xlane.f32.xlu0 %v1072_v29 }
 0x13c   : > { %1097 = vadd.xlane.f32.xlu0 %v1096_v34 }
 0x148   : > { %1132 = vperm.xlu1 %1641, %v1129_v40  }
 0x152   : > { %1108 = vperm.xlu0 %1640, %v1526_v41  }
 0x16c   : > { %1100 = vadd.xlane.f32.xlu1 %v1099_v36 }
 0x1ac   : > { %v1083_v8 = vpop.xlane.xlu1 %1082 }
 0x1ad   : > { %v1056_v43 = vpop.xlane.xlu0 %1055 }
 0x1b0   : > { %v1062_v44 = vpop.xlane.xlu1 %1061 }
 0x1b1   : > { %v1059_v46 = vpop.xlane.xlu0 %1058 }
 0x1b4   : > { %v1065_v15 = vpop.xlane.xlu1 %1064 }
 0x1b5   : > { %v1080_v48 = vpop.xlane.xlu0 %1079 }
 0x1b8   : > { %v1071_v49 = vpop.xlane.xlu1 %1070 }
 0x1b9   : > { %v1068_v50 = vpop.xlane.xlu0 %1067 }
 0x1bc   : > { %v1089_v51 = vpop.xlane.xlu1 %1088 }
 0x1bd   : > { %v1086_v52 = vpop.xlane.xlu0 %1085 }
 0x1c0   : > { %v1095_v54 = vpop.xlane.xlu1 %1094 }
 0x1c1   : > { %v1092_v53 = vpop.xlane.xlu0 %1091 }
 0x1c4   : > { %v1077_v56 = vpop.xlane.xlu1 %1076 }
 0x1c5   : > { %v1074_v55 = vpop.xlane.xlu0 %1073 }
 0x1c8   : > { %v1133_v59 = vpop.permute.xlu1 %1132 }
 0x1c9   : > { %v1098_v57 = vpop.xlane.xlu0 %1097  ;;  %v1153_v0 = vrot.slane %v1133_v59, %v1152_v58  ;;  %v1137_v2 = vrot.slane %v1133_v59, %v1986_v45  ;;  %v1157_v6 = vrot.slane %v1133_v59, %v1156_v62  ;;  %v1161_v19 = vrot.slane %v1133_v59, %v1160_v9 }
 0x1ca   : > { %v1149_v14 = vrot.slane %v1133_v59, %v1148_v11  ;;  %v1141_v21 = vrot.slane %v1133_v59, %v1989_v47  ;;  %v1145_v28 = vrot.slane %v1133_v59, %v470_v25 }
 0x1d1   : > { %v1109_v61 = vpop.permute.xlu0 %1108 }
 0x1d2   : > { %v1120_v63 = vadd.f32 %v1109_v61, %v1083_v8  ;;  %v1111_v1 = vadd.f32 %v1109_v61, %v1056_v43  ;;  %v1122_v5 = vadd.f32 %v1109_v61, %v1089_v51  ;;  %v1112_v16 = vadd.f32 %v1109_v61, %v1059_v46 }
 0x1d3   : > { %v1124_v17 = vadd.f32 %v1109_v61, %v1095_v54  ;;  %v1119_v18 = vadd.f32 %v1109_v61, %v1080_v48  ;;  %v1118_v12 = vadd.f32 %v1109_v61, %v1077_v56  ;;  %v1113_v20 = vadd.f32 %v1109_v61, %v1062_v44  ;;  %v1554_v48 = vpop.f32.mrb[0].mxu1 }
 0x1d4   : > { %v1183_v3 = vsub.f32 %v1120_v63, %v1153_v0  ;;  %v1174_v4 = vsub.f32 %v1111_v1, %v1137_v2  ;;  %v1185_v10 = vsub.f32 %v1122_v5, %v1157_v6  ;;  %v1175_v7 = vsub.f32 %v1112_v16, %v1137_v2 }
 0x1d5   : > { %v1187_v13 = vsub.f32 %v1124_v17, %v1161_v19  ;;  %v1182_v45 = vsub.f32 %v1119_v18, %v1153_v0  ;;  %v1181_v22 = vsub.f32 %v1118_v12, %v1149_v14  ;;  %v1176_v23 = vsub.f32 %v1113_v20, %v1141_v21 }
 0x1d6   : > { %1234 = vperm.xlu0 %1640, %v1183_v3   ;;  %1207 = vperm.xlu1 %1641, %v1174_v4   ;;  %v1114_v24 = vadd.f32 %v1109_v61, %v1065_v15  ;;  %v1115_v27 = vadd.f32 %v1109_v61, %v1068_v50  ;;  %v1116_v31 = vadd.f32 %v1109_v61, %v1071_v49  ;;  %v625_v49 = vpop.f32.mrb[1].mxu1 }
 0x1d7   : > { %v1121_v33 = vadd.f32 %v1109_v61, %v1086_v52  ;;  %v1123_v35 = vadd.f32 %v1109_v61, %v1092_v53  ;;  %v1117_v36 = vadd.f32 %v1109_v61, %v1074_v55  ;;  %v1125_v40 = vadd.f32 %v1109_v61, %v1098_v57  ;;  %v809_v53 = vpop.f32.mrb[2].mxu1 }
 0x1d8   : > { %v1177_v26 = vsub.f32 %v1114_v24, %v1141_v21  ;;  %v1178_v29 = vsub.f32 %v1115_v27, %v1145_v28  ;;  %v1179_v32 = vsub.f32 %v1116_v31, %v1145_v28  ;;  %v1165_v8 = vrot.slane %v1133_v59, %v1164_v38  ;;  %v1565_v54 = vpop.f32.mrb[3].mxu1 }
 0x1d9   : > { %v1184_v34 = vsub.f32 %v1121_v33, %v1157_v6  ;;  %v1186_v47 = vsub.f32 %v1123_v35, %v1161_v19  ;;  %v1180_v39 = vsub.f32 %v1117_v36, %v1149_v14  ;;  %v471_v15 = vrot.slane %v2006_v60, %v470_v25 }
 0x1da   : > { %1240 = vperm.xlu0 %1640, %v1185_v10   ;;  %1210 = vperm.xlu1 %1641, %v1175_v7   ;;  %v1188_v46 = vsub.f32 %v1125_v40, %v1165_v8  ;;  %v665_v52 = vrot.slane %v1983_v42, %v470_v25  ;;  %v1255_v42 = vand.u32 127, %v460_v30 }
 0x1db   : > { %v631_v50 = vadd.f32 %v1554_v48, %v471_v15  ;;  %v626_v51 = vadd.f32 %v625_v49, %v471_v15 }
 0x1dc   : > { %v810_v60 = vadd.f32 %v809_v53, %v665_v52  ;;  %v1260_v1 = vadd.s32 4294967288, %v1255_v42  ;;  %v1258_v5 = vsub.s32 %v1255_v42, %v1972_v37 }
 0x1dd   : > { %636 = vst.msk [vmem:[%s443_s21 + $0x8] sm:$0xff] %vm634_vm2, %v631_v50  ;;  %635 = vst.msk [vmem:[%s443_s21] sm:$0xff] %vm634_vm2, %v626_v51  ;;  %s1775_s21 = smov [#allocation3]  }
 0x1de   : > { %1246 = vperm.xlu0 %1640, %v1187_v13   ;;  %1231 = vperm.xlu1 %1641, %v1182_v45   ;;  %814 = vst.msk [vmem:[%s438_s23] sm:$0xff] %vm813_vm3, %v810_v60  ;;  %v1263_v4 = vsub.s32 %v1260_v1, %v1972_v37  ;;  %s1710_s27 = sshll.u32 %s1775_s21, 4  ;;  %s1711_s27 = int_to_ptr.vmem [resolvable:$false] %s1710_s27 }
 0x1df   : > { %s1712_s18 = scalar_lea.vmem %s1711_s27, 256  ;;  %p1713_p0 = scmp.lt.s32.totalorder %s2185_s25, %s1711_s27 }
 0x1e0   : > { %p1714_p1 = scmp.lt.s32.totalorder %s1712_s18, %s1706_s15 }
 0x1e2   : > { %1228 = vperm.xlu0 %1640, %v1181_v22   ;;  %1213 = vperm.xlu1 %1641, %v1176_v23   ;;  %p1715_p2 = por %p1714_p1, %p1713_p0 }
 0x1e4   : > { %p1716_p3 = pnand %p1715_p2, %p1709_p13 }
 0x1e6   : > { %1216 = vperm.xlu1 %1641, %v1177_v26  }
 0x1ea   : > { %1219 = vperm.xlu1 %1641, %v1178_v29  }
 0x1ee   : > { %1222 = vperm.xlu1 %1641, %v1179_v32  }
 0x1f2   : > { %1237 = vperm.xlu1 %1641, %v1184_v34  }
 0x1f6   : > { %1243 = vperm.xlu1 %1641, %v1186_v47  }
 0x1f9   : > { %v1101_v41 = vpop.xlane.xlu1 %1100 }
 0x1fa   : > { %v1126_v43 = vadd.f32 %v1109_v61, %v1101_v41  ;;  %1225 = vperm.xlu1 %1641, %v1180_v39  }
 0x1fc   : > { %v1189_v44 = vsub.f32 %v1126_v43, %v1165_v8 }
 0x1fe   : > { %1249 = vperm.xlu1 %1641, %v1188_v46   ;;  %1252 = vperm.xlu0 %1640, %v1189_v44  }
 0x255   : > { %v1208_v55 = vpop.permute.xlu1 %1207  ;;  %v1235_v59 = vpop.permute.xlu0 %1234 }
 0x256   : > { %v1259_v30 = vrot.slane %v1208_v55, %v1258_v5  ;;  %v1301_v21 = vrot.slane %v1235_v59, %v1263_v4 }
 0x259   : > { %v1211_v56 = vpop.permute.xlu1 %1210  ;;  %v1241_v63 = vpop.permute.xlu0 %1240 }
 0x25a   : > { %v1264_v10 = vrot.slane %v1211_v56, %v1263_v4  ;;  %v1310_v24 = vrot.slane %v1241_v63, %v1263_v4 }
 0x25c   : > { %v1266_v45 = vsel %vm1265_vm4, %v1264_v10, %v1259_v30 }
 0x25d   : > { %v1232_v57 = vpop.permute.xlu1 %1231  ;;  %v1247_v2 = vpop.permute.xlu0 %1246 }
 0x25e   : > { %v1297_v11 = vrot.slane %v1232_v57, %v1258_v5  ;;  %v1319_v27 = vrot.slane %v1247_v2, %v1263_v4 }
 0x260   : > { %v1302_v28 = vsel %vm1265_vm4, %v1301_v21, %v1297_v11 }
 0x261   : > { %v1214_v58 = vpop.permute.xlu1 %1213  ;;  %v1229_v17 = vpop.permute.xlu0 %1228 }
 0x262   : > { %v1270_v7 = vrot.slane %v1214_v58, %v1258_v5  ;;  %v1292_v12 = vrot.slane %v1229_v17, %v1263_v4 }
 0x265   : > { %v1217_v61 = vpop.permute.xlu1 %1216 }
 0x266   : > { %v1274_v16 = vrot.slane %v1217_v61, %v1263_v4 }
 0x268   : > { %v1275_v19 = vsel %vm1265_vm4, %v1274_v16, %v1270_v7 }
 0x269   : > { %v1220_v62 = vpop.permute.xlu1 %1219  ;;  %v1331_v22 = vsel %vm1330_vm5, %v1275_v19, %v1266_v45 }
 0x26a   : > { %v1279_v18 = vrot.slane %v1220_v62, %v1258_v5 }
 0x26d   : > { %v1223_v0 = vpop.permute.xlu1 %1222 }
 0x26e   : > { %v1283_v6 = vrot.slane %v1223_v0, %v1263_v4 }
 0x270   : > { %v1284_v37 = vsel %vm1265_vm4, %v1283_v6, %v1279_v18 }
 0x271   : > { %v1238_v3 = vpop.permute.xlu1 %1237  ;;  %v1333_v25 = vsel %vm1332_vm6, %v1284_v37, %v1331_v22 }
 0x272   : > { %v1306_v20 = vrot.slane %v1238_v3, %v1258_v5 }
 0x274   : > { %v1311_v33 = vsel %vm1265_vm4, %v1310_v24, %v1306_v20 }
 0x275   : > { %v1244_v9 = vpop.permute.xlu1 %1243 }
 0x276   : > { %v1315_v23 = vrot.slane %v1244_v9, %v1258_v5 }
 0x278   : > { %v1320_v36 = vsel %vm1265_vm4, %v1319_v27, %v1315_v23 }
 0x279   : > { %v1226_v13 = vpop.permute.xlu1 %1225 }
 0x27a   : > { %v1288_v14 = vrot.slane %v1226_v13, %v1258_v5 }
 0x27c   : > { %v1293_v26 = vsel %vm1265_vm4, %v1292_v12, %v1288_v14 }
 0x27d   : > { %v1335_v29 = vsel %vm1334_vm7, %v1293_v26, %v1333_v25  ;;  %v1250_v31 = vpop.permute.xlu1 %1249  ;;  %v1253_v32 = vpop.permute.xlu0 %1252 }
 0x27e   : > { %v1337_v34 = vsel %vm1336_vm8, %v1302_v28, %v1335_v29  ;;  %v1324_v35 = vrot.slane %v1250_v31, %v1258_v5  ;;  %v1328_v47 = vrot.slane %v1253_v32, %v1263_v4 }
 0x27f   : > { %v1339_v38 = vsel %vm1338_vm9, %v1311_v33, %v1337_v34 }
 0x280   : > { %v1329_v39 = vsel %vm1265_vm4, %v1328_v47, %v1324_v35  ;;  %v1341_v40 = vsel %vm1340_vm10, %v1320_v36, %v1339_v38 }
 0x281   : > { %v1343_v41 = vsel %vm1342_vm11, %v1329_v39, %v1341_v40 }
 0x282   : > { %1346 = vst.msk [vmem:[%s414_s13] sm:$0xff] %vm1345_vm12, %v1343_v41 }
 0x283   : > { %1719 = shalt.err (!%p1716_p3)
}
 0x284   : > { %s1720_s23 = scalar_lea.hbm %s2183_s12, 128  ;;  %s1724_s17 = scalar_lea.hbm %s2237_s10, 256 }
 0x285   : > { %p1721_p4 = scmp.ne.s32.totalorder %s2183_s12, %s1720_s23  ;;  %p1725_p9 = scmp.lt.u32.totalorder %s2183_s12, %s2237_s10 }
 0x286   : > { %p1726_p10 = scmp.lt.u32.totalorder %s1724_s17, %s1720_s23  ;;  %p1728_p12 = scmp.lt.u32.totalorder %s1720_s23, %s2183_s12 }
 0x287   : > { %p1722_p7 = pnand %p1721_p4, %p1877_p5 }
 0x288   : > { %p1727_p11 = por %p1726_p10, %p1725_p9 }
 0x289   : > { %p1723_p8 = pneg %p1722_p7 }
 0x28a   : > { %p1729_p13 = por %p1728_p12, %p1727_p11 }
 0x28c   : > { %p1730_p0 = pnand %p1729_p13, %p1723_p8 }
 0x28e   : > { %1733 = shalt.err (!%p1730_p0)
}
 0x28f   : > { %1596 = dma.vmem_to_hbm [thread:$0]  (%p1877_p5), %s2185_s25, 128, %s2183_s12, %s1352_s14  }
 0x290 PF: > { %p1602_p1 = scmp.ge.s32.totalorder %s1768_s22, 2  ;;  %s1395_s30 = sand.u32 1, %s1756_s19  }
 0x291   : > { %s1396_s15 = scalar_lea.sflag [#allocation4], %s1395_s30 }
 0x292   : > { %p1599_p2 = pnand %p1602_p1, %p1881_p6 }
 0x294   : > { %1751 = dma.done.wait (!%p1599_p2), %s1396_s15, 128  }
 0x295   : > { %1753 = vsyncadd (!%p1599_p2), %s1396_s15, 4294967168  ;;  %s2244_s21 = sld [smem:[#allocation6_spill]]  ;;  %s2245_s27 = sld [smem:[#allocation7_spill]] }
 0x296   : > { %p24_p3 = scmp.ge.s32.totalorder %s1864_s24, 4   ;;  %s2246_s19 = smov %s1760_s20 }
 0x297   : > { %s2249_s22 = smov %s1864_s24 }
 0x298   :  { %26 = sbr.rel (!%p24_p3) target bundleno = 6 (0x6), region = 121 }
 0x29b   : > { %s2247_s20 = smov %s2244_s21  ;;  %s2248_s21 = smov %s2245_s27 }
 0x29f   :  { %1409 = vsyncpa [#allocation4], 1 }
 0x2a0   :  { %1411 = vsyncpa [#allocation4 + $0x1], 1 }

</bundles_post_ra>
